<compile_context>
chip_gen: v6e
topology: v6e:2x2x1
jax: 0.10.0
libtpu: 0.0.40
codegen_flags: <defaults>
</compile_context>

<pallas_src>
import math
import functools

import numpy as np
import jax
import jax.numpy as jnp
from jax.experimental import pallas as pl
from jax.experimental.pallas import tpu as pltpu


def make_pe_table(max_seq_len: int, d_model: int) -> jnp.ndarray:
    """Exactly mirrors the PyTorch __init__ loop (incl. the 2*i / 2*(i+1) exponents)."""
    assert d_model % 2 == 0, "d_model must be even (PyTorch loop writes pe[pos, i+1])"
    pe = np.zeros((max_seq_len, d_model), dtype=np.float32)
    for pos in range(max_seq_len):
        for i in range(0, d_model, 2):
            pe[pos, i] = math.sin(pos / 10000 ** (2 * i / d_model))
            pe[pos, i + 1] = math.cos(pos / 10000 ** (2 * (i + 1) / d_model))
    return jnp.asarray(pe)


def _pe_splat_kernel(x_ref, pe_ref, o_ref, *, scale):
    # x_ref/o_ref: (R, L); pe_ref: (R, 1) float32.
    # pe broadcasts along the lane axis: a per-lane VPU splat (no XLU relayout).
    o_ref[...] = (x_ref[...].astype(jnp.float32) * scale + pe_ref[...]).astype(o_ref.dtype)


def _pe_dense_kernel(x_ref, pe_ref, o_ref, *, scale):
    # x_ref/o_ref: (1, R, L); pe_ref: (1, R, L) float32 (pre-expanded wrapper-side).
    o_ref[...] = (x_ref[...].astype(jnp.float32) * scale + pe_ref[...]).astype(o_ref.dtype)


def _chip_params():
    """(target block bytes, min parallel grid steps) per TPU generation."""
    kind = ""
    try:
        kind = jax.devices()[0].device_kind.lower()
    except Exception:
        pass
    if ("v7" in kind) or ("7x" in kind):
        # 3.2 TB/s HBM: bigger blocks amortize the ~0.35us/step overhead.
        # 6 buffers (in+out+pe, double-buffered) x 4 MiB = 24 MiB < 32 MiB scoped default.
        # >= 4 grid steps so both TensorCores get work.
        return 4 << 20, 4
    if "v6" in kind:
        return 3 << 20, 1   # fits comfortably under the 32 MiB scoped default
    # v5e (16 MiB scoped-VMEM default) and unknown chips: ~2 MiB blocks.
    return 2 << 20, 1


def _choose_tiles(rows, lanes, itemsize, target_bytes, min_steps=1):
    """Pick (row_tile, lane_tile) honoring (8,128) tiling and the VMEM target."""
    # Sublane packing alignment: 8 for f32, 16 for bf16/f16, 32 for int8/fp8.
    sub = max(8, (8 * 4) // max(1, itemsize))

    # Lane tile: full lane extent unless a minimal-row block already exceeds the
    # target; then tile lanes in multiples of 128 (only legal when 128-aligned).
    if lanes % 128 == 0 and sub * lanes * itemsize > target_bytes:
        L = (target_bytes // (sub * itemsize)) // 128 * 128
        L = int(min(max(128, L), lanes))
    else:
        # TODO(synk): lanes not 128-aligned and huge -> full-extent lane block is
        # the only legal choice here; pad the lane axis if this ever OOMs VMEM.
        L = lanes

    if rows <= sub:
        R = rows  # full-extent block is always legal
    else:
        max_r = max(sub, target_bytes // max(1, L * itemsize))
        R = int(min(rows, max_r))
        R = max(sub, (R // sub) * sub)

    # Keep enough grid steps for megacore sharding (v7x has 2 TensorCores).
    def _n_tiles(r, l):
        return pl.cdiv(rows, r) * pl.cdiv(lanes, l)

    while _n_tiles(R, L) < min_steps and R > sub:
        R = max(sub, ((R // 2) // sub) * sub)

    return R, L


def positional_encoder(x: jnp.ndarray, pe_table: jnp.ndarray) -> jnp.ndarray:
    """x: [B, T, C, H, W]; pe_table: [max_seq_len, C] (C == d_model)."""
    B, T, C, H, W = x.shape
    HW = H * W
    scale = float(math.sqrt(C))  # sqrt(d_model)
    itemsize = x.dtype.itemsize
    target_bytes, min_steps = _chip_params()

    if HW % 128 == 0:
        # --- Path A: lanes already dense. Fold B into the row axis. ---
        rows, lanes = B * T * C, HW
        x2 = x.reshape(rows, lanes)
        # pe for row (b*T*C + t*C + c) is pe_table[t, c]; kept in f32.
        pe_col = jnp.tile(pe_table[:T].astype(jnp.float32).reshape(T * C, 1), (B, 1))

        R, L = _choose_tiles(rows, lanes, itemsize, target_bytes, min_steps)
        grid = (pl.cdiv(rows, R), pl.cdiv(lanes, L))

        cost = pl.CostEstimate(
            flops=2 * rows * lanes,
            bytes_accessed=2 * rows * lanes * itemsize + rows * 4,
            transcendentals=0,
        )
        out2 = pl.pallas_call(
            functools.partial(_pe_splat_kernel, scale=scale),
            out_shape=jax.ShapeDtypeStruct((rows, lanes), x.dtype),
            grid=grid,
            in_specs=[
                pl.BlockSpec((R, L), lambda r, l: (r, l)),
                pl.BlockSpec((R, 1), lambda r, l: (r, 0)),
            ],
            out_specs=pl.BlockSpec((R, L), lambda r, l: (r, l)),
            compiler_params=pltpu.CompilerParams(
                dimension_semantics=("parallel", "parallel"),
            ),
            cost_estimate=cost,
            input_output_aliases={0: 0},  # pure block-for-block overwrite of x
        )(x2, pe_col)
        return out2.reshape(B, T, C, H, W)

    # --- Path B: HW not 128-aligned -> make the lane axis C*H*W (lane-dense). ---
    rows, lanes = T, C * HW
    x2 = x.reshape(B, rows, lanes)
    # pe value for lane j = c*HW + k is pe_table[t, c]; kept in f32.
    pe_dense = jnp.repeat(pe_table[:T].astype(jnp.float32), HW, axis=1).reshape(1, rows, lanes)

    R, L = _choose_tiles(rows, lanes, itemsize, target_bytes, min_steps)
    # B innermost: pe block index ignores b, so the pe tile is reused across B.
    grid = (pl.cdiv(rows, R), pl.cdiv(lanes, L), B)

    cost = pl.CostEstimate(
        flops=2 * B * rows * lanes,
        bytes_accessed=2 * B * rows * lanes * itemsize + rows * lanes * 4,
        transcendentals=0,
    )
    out2 = pl.pallas_call(
        functools.partial(_pe_dense_kernel, scale=scale),
        out_shape=jax.ShapeDtypeStruct((B, rows, lanes), x.dtype),
        grid=grid,
        in_specs=[
            pl.BlockSpec((1, R, L), lambda r, l, b: (b, r, l)),
            pl.BlockSpec((1, R, L), lambda r, l, b: (0, r, l)),
        ],
        out_specs=pl.BlockSpec((1, R, L), lambda r, l, b: (b, r, l)),
        compiler_params=pltpu.CompilerParams(
            dimension_semantics=("parallel", "parallel", "parallel"),
        ),
        cost_estimate=cost,
        input_output_aliases={0: 0},
    )(x2, pe_dense)
    return out2.reshape(B, T, C, H, W)


if __name__ == "__main__":
    # Small shapes consistent with forward(): [B, T, C, H, W], d_model = C.
    B, T, C, H, W = 2, 8, 4, 16, 16
    max_seq_len = 16

    key = jax.random.PRNGKey(0)
    x = jax.random.normal(key, (B, T, C, H, W), dtype=jnp.float32)

    pe_table = make_pe_table(max_seq_len, C)

    # Pure-JAX reference (computed before the kernel call; the kernel aliases
    # its input buffer, JAX copies when not donated -- this is belt & braces).
    ref = x * math.sqrt(C) + pe_table[:T][None, :, :, None, None]

    out = positional_encoder(x, pe_table)
    out = jax.block_until_ready(out)

    np.testing.assert_allclose(np.asarray(out), np.asarray(ref), rtol=1e-6, atol=1e-6)
    print("KERNEL_OK")
</pallas_src>

<mosaic_0001>
module attributes {stable_mosaic.version = 11 : i64} {
  func.func @_pe_splat_kernel(%arg0: i32, %arg1: i32, %arg2: memref<64x256xf32, #tpu.memory_space<vmem>>, %arg3: memref<64x1xf32, #tpu.memory_space<vmem>>, %arg4: memref<64x256xf32, #tpu.memory_space<vmem>>) attributes {dimension_semantics = [#tpu.dimension_semantics<parallel>, #tpu.dimension_semantics<parallel>], iteration_bounds = array<i64: 1, 1>, scalar_prefetch = 0 : i64, scratch_operands = 0 : i64, tpu.core_type = #tpu.core_type<tc>, window_params = [{transform_indices = @transform_0, window_bounds = array<i64: 64, 256>}, {transform_indices = @transform_1, window_bounds = array<i64: 64, 1>}, {transform_indices = @transform_2, window_bounds = array<i64: 64, 256>}]} {
    %c0 = arith.constant 0 : index
    %c0_0 = arith.constant 0 : index
    %0 = vector.load %arg2[%c0, %c0_0] : memref<64x256xf32, #tpu.memory_space<vmem>>, vector<64x256xf32>
    %cst = arith.constant 2.000000e+00 : f32
    %1 = vector.broadcast %cst : f32 to vector<64x256xf32>
    %2 = arith.mulf %0, %1 : vector<64x256xf32>
    %c0_1 = arith.constant 0 : index
    %c0_2 = arith.constant 0 : index
    %3 = vector.load %arg3[%c0_1, %c0_2] : memref<64x1xf32, #tpu.memory_space<vmem>>, vector<64x1xf32>
    %4 = vector.broadcast %3 : vector<64x1xf32> to vector<64x256xf32>
    %5 = arith.addf %2, %4 : vector<64x256xf32>
    %c0_3 = arith.constant 0 : index
    %c0_4 = arith.constant 0 : index
    %6 = vector.load %arg4[%c0_3, %c0_4] : memref<64x256xf32, #tpu.memory_space<vmem>>, vector<64x256xf32>
    tpu.vector_store %arg4[%c0_3, %c0_4], %5 {strides = array<i32>} : memref<64x256xf32, #tpu.memory_space<vmem>>, vector<64x256xf32>,
    return
  }
  func.func @transform_0(%arg0: i32, %arg1: i32) -> (i32, i32) {
    %c0_i32 = arith.constant 0 : i32
    return %arg0, %arg1 : i32, i32
  }
  func.func @transform_1(%arg0: i32, %arg1: i32) -> (i32, i32) {
    %c0_i32 = arith.constant 0 : i32
    %c0_i32_0 = arith.constant 0 : i32
    return %arg0, %c0_i32 : i32, i32
  }
  func.func @transform_2(%arg0: i32, %arg1: i32) -> (i32, i32) {
    %c0_i32 = arith.constant 0 : i32
    return %arg0, %arg1 : i32, i32
  }
}

</mosaic_0001>

<bundles_post_ra>
// kernel: tpu_custom_call.1
= control target key start
LH: loop header
LB: loop body
LE: loop exit
PB: predicated region body
PF: predicated region fallthrough
CT: control target
= control target key end

     0   :  { %7 = vsyncpa [#allocation3], 0  ;;  %s262_s0 = inlined_call_operand.hbm [shape: f32[64,256], index: 0, kind: input, shape index: {}, may-alias: {0,2}]   ;;  %s263_s1 = inlined_call_operand.vmem [shape: f32[64,1], index: 1, kind: input, shape index: {}]   ;;  %s264_s2 = inlined_call_operand.hbm [shape: f32[64,256], index: 2, kind: output, shape index: {}, may-alias: {0,2}]  }
   0x1   :  { %8 = vsyncpa [#allocation4], 0  ;;  %s206_s9 = smov [#allocation2]  }
   0x2   :  { %s14_s10 = sshll.u32 %s206_s9, 4  ;;  %s15_s10 = int_to_ptr.vmem [resolvable:$true] %s14_s10 }
   0x3   :  { %s170_s11 = scalar_lea.vmem %s15_s10, 2048  ;;  %p175_p1 = scmp.lt.s32.totalorder %s15_s10, %s15_s10 }
   0x4   :  { %p171_p0 = scmp.ne.s32.totalorder %s15_s10, %s170_s11  ;;  %p176_p2 = scmp.lt.s32.totalorder %s170_s11, %s170_s11 }
   0x6   :  { %p177_p3 = por %p176_p2, %p175_p1 }
   0x8   :  { %p178_p4 = pnand %p177_p3, %p171_p0 }
   0xa   :  { %181 = shalt.err (!%p178_p4)
}
   0xb   :  { %s207_s12 = smov 256   ;;  %s208_s13 = smov 16  }
   0xc   :  { %20 = dma.hbm_to_vmem [thread:$0]  %s262_s0, 2048, %s15_s10, [#allocation3], %s207_s12, %s207_s12, %s208_s13  }
   0xd   :  { %202 = dma.done.wait [#allocation3], 2048  }
   0xe   :  { %203 = vsyncadd [#allocation3], 4294965248  ;;  %v209_v0 = vmov 0   ;;  %v60_v1 = vld [vmem:[%s263_s1 + $0x10] sm:$0xff]  ;;  %v58_v2 = vld [vmem:[%s263_s1] sm:$0xff] }
   0xf   :  { %161 = vset.pattern.permute.xlu1 %v209_v0  ;;  %160 = vset.pattern.permute.xlu0 %v209_v0  ;;  %v61_v3 = vld [vmem:[%s263_s1 + $0x18] sm:$0xff]  ;;  %v59_v4 = vld [vmem:[%s263_s1 + $0x8] sm:$0xff]  ;;  %v62_v6 = vld [vmem:[%s263_s1 + $0x20] sm:$0xff] }
  0x10   :  { %78 = vperm.xlu1 %161, %v60_v1   ;;  %68 = vperm.xlu0 %160, %v58_v2   ;;  %v63_v5 = vld [vmem:[%s263_s1 + $0x28] sm:$0xff]  ;;  %v65_v7 = vld [vmem:[%s263_s1 + $0x38] sm:$0xff]  ;;  %v64_v8 = vld [vmem:[%s263_s1 + $0x30] sm:$0xff]  ;;  %s210_s1 = smov [#allocation5]  }
  0x11   :  { %v30_v9 = vld [vmem:[#allocation2 + $0x20] sm:$0xff]  ;;  %v31_v10 = vld [vmem:[#allocation2 + $0x28] sm:$0xff]  ;;  %v32_v14 = vld [vmem:[#allocation2 + $0x30] sm:$0xff]  ;;  %s143_s3 = sshll.u32 %s210_s1, 4  ;;  %s144_s3 = int_to_ptr.vmem [resolvable:$true] %s143_s3 }
  0x12   :  { %v26_v11 = vld [vmem:[#allocation2] sm:$0xff]  ;;  %v27_v12 = vld [vmem:[#allocation2 + $0x8] sm:$0xff]  ;;  %v46_v13 = vmul.f32 2.0, %v30_v9  ;;  %v47_v15 = vmul.f32 2.0, %v31_v10  ;;  %v33_v18 = vld [vmem:[#allocation2 + $0x38] sm:$0xff]  ;;  %v48_v23 = vmul.f32 2.0, %v32_v14  ;;  %p187_p6 = scmp.lt.s32.totalorder %s144_s3, %s144_s3 }
  0x13   :  { %v42_v16 = vmul.f32 2.0, %v26_v11  ;;  %v43_v17 = vmul.f32 2.0, %v27_v12  ;;  %v28_v19 = vld [vmem:[#allocation2 + $0x10] sm:$0xff]  ;;  %v29_v20 = vld [vmem:[#allocation2 + $0x18] sm:$0xff]  ;;  %v49_v24 = vmul.f32 2.0, %v33_v18  ;;  %v34_v33 = vld [vmem:[#allocation2 + $0x40] sm:$0xff] }
  0x14   :  { %83 = vperm.xlu1 %161, %v61_v3   ;;  %73 = vperm.xlu0 %160, %v59_v4   ;;  %v44_v25 = vmul.f32 2.0, %v28_v19  ;;  %v45_v26 = vmul.f32 2.0, %v29_v20  ;;  %v36_v27 = vld [vmem:[#allocation2 + $0x50] sm:$0xff]  ;;  %v37_v32 = vld [vmem:[#allocation2 + $0x58] sm:$0xff]  ;;  %v35_v34 = vld [vmem:[#allocation2 + $0x48] sm:$0xff]  ;;  %v50_v39 = vmul.f32 2.0, %v34_v33 }
  0x15   :  { %v52_v37 = vmul.f32 2.0, %v36_v27  ;;  %v53_v38 = vmul.f32 2.0, %v37_v32  ;;  %v51_v40 = vmul.f32 2.0, %v35_v34  ;;  %v40_v41 = vld [vmem:[#allocation2 + $0x70] sm:$0xff]  ;;  %v41_v46 = vld [vmem:[#allocation2 + $0x78] sm:$0xff]  ;;  %v38_v47 = vld [vmem:[#allocation2 + $0x60] sm:$0xff] }
  0x16   :  { %v39_v48 = vld [vmem:[#allocation2 + $0x68] sm:$0xff]  ;;  %v56_v51 = vmul.f32 2.0, %v40_v41  ;;  %v57_v52 = vmul.f32 2.0, %v41_v46  ;;  %v54_v53 = vmul.f32 2.0, %v38_v47  ;;  %s182_s4 = scalar_lea.vmem %s144_s3, 2048 }
  0x17   :  { %v55_v54 = vmul.f32 2.0, %v39_v48  ;;  %p183_p5 = scmp.ne.s32.totalorder %s144_s3, %s182_s4  ;;  %p188_p7 = scmp.lt.s32.totalorder %s182_s4, %s182_s4 }
  0x18   :  { %93 = vperm.xlu1 %161, %v63_v5   ;;  %88 = vperm.xlu0 %160, %v62_v6  }
  0x19   :  { %p189_p8 = por %p188_p7, %p187_p6 }
  0x1b   :  { %p190_p9 = pnand %p189_p8, %p183_p5 }
  0x1c   :  { %103 = vperm.xlu1 %161, %v65_v7   ;;  %98 = vperm.xlu0 %160, %v64_v8  }
  0x8b   :  { %v79_v21 = vpop.permute.xlu1 %78  ;;  %v69_v22 = vpop.permute.xlu0 %68 }
  0x8c   :  { %v110_v28 = vadd.f32 %v79_v21, %v46_v13  ;;  %v111_v29 = vadd.f32 %v79_v21, %v47_v15  ;;  %v106_v30 = vadd.f32 %v69_v22, %v42_v16  ;;  %v107_v31 = vadd.f32 %v69_v22, %v43_v17 }
  0x8e   :  { %126 = vst [vmem:[#allocation5 + $0x20] sm:$0xff] %v110_v28  ;;  %127 = vst [vmem:[#allocation5 + $0x28] sm:$0xff] %v111_v29 }
  0x8f   :  { %122 = vst [vmem:[#allocation5] sm:$0xff] %v106_v30  ;;  %123 = vst [vmem:[#allocation5 + $0x8] sm:$0xff] %v107_v31  ;;  %v84_v35 = vpop.permute.xlu1 %83  ;;  %v74_v36 = vpop.permute.xlu0 %73 }
  0x90   :  { %v112_v42 = vadd.f32 %v84_v35, %v48_v23  ;;  %v113_v43 = vadd.f32 %v84_v35, %v49_v24  ;;  %v108_v44 = vadd.f32 %v74_v36, %v44_v25  ;;  %v109_v45 = vadd.f32 %v74_v36, %v45_v26 }
  0x92   :  { %128 = vst [vmem:[#allocation5 + $0x30] sm:$0xff] %v112_v42  ;;  %129 = vst [vmem:[#allocation5 + $0x38] sm:$0xff] %v113_v43 }
  0x93   :  { %124 = vst [vmem:[#allocation5 + $0x10] sm:$0xff] %v108_v44  ;;  %125 = vst [vmem:[#allocation5 + $0x18] sm:$0xff] %v109_v45  ;;  %v94_v49 = vpop.permute.xlu1 %93  ;;  %v89_v50 = vpop.permute.xlu0 %88 }
  0x94   :  { %v116_v55 = vadd.f32 %v94_v49, %v52_v37  ;;  %v117_v56 = vadd.f32 %v94_v49, %v53_v38  ;;  %v114_v57 = vadd.f32 %v89_v50, %v50_v39  ;;  %v115_v58 = vadd.f32 %v89_v50, %v51_v40 }
  0x96   :  { %132 = vst [vmem:[#allocation5 + $0x50] sm:$0xff] %v116_v55  ;;  %133 = vst [vmem:[#allocation5 + $0x58] sm:$0xff] %v117_v56 }
  0x97   :  { %130 = vst [vmem:[#allocation5 + $0x40] sm:$0xff] %v114_v57  ;;  %131 = vst [vmem:[#allocation5 + $0x48] sm:$0xff] %v115_v58  ;;  %v104_v59 = vpop.permute.xlu1 %103  ;;  %v99_v60 = vpop.permute.xlu0 %98 }
  0x98   :  { %v120_v61 = vadd.f32 %v104_v59, %v56_v51  ;;  %v121_v62 = vadd.f32 %v104_v59, %v57_v52  ;;  %v118_v63 = vadd.f32 %v99_v60, %v54_v53  ;;  %v119_v0 = vadd.f32 %v99_v60, %v55_v54 }
  0x9a   :  { %136 = vst [vmem:[#allocation5 + $0x70] sm:$0xff] %v120_v61  ;;  %137 = vst [vmem:[#allocation5 + $0x78] sm:$0xff] %v121_v62 }
  0x9b   :  { %134 = vst [vmem:[#allocation5 + $0x60] sm:$0xff] %v118_v63  ;;  %135 = vst [vmem:[#allocation5 + $0x68] sm:$0xff] %v119_v0 }
  0x9c   :  { %193 = shalt.err (!%p190_p9)
}
  0x9d   :  { %149 = dma.vmem_to_hbm [thread:$0]  %s144_s3, 2048, %s264_s2, [#allocation4], %s207_s12, %s207_s12, %s208_s13  }
  0x9e   :  { %204 = dma.done.wait [#allocation4], 2048  }
  0x9f   :  { %205 = vsyncadd [#allocation4], 4294965248 }
  0xa0   :  { %153 = vsyncpa [#allocation3], 1 }
  0xa1   :  { %154 = vsyncpa [#allocation4], 1 }

</bundles_post_ra>
